<compile_context>
chip_gen: v7x
topology: tpu7x:2x2x1
jax: 0.10.0
libtpu: 0.0.40
codegen_flags: <defaults>
</compile_context>

<pallas_src>
import functools

import jax
import jax.numpy as jnp
import numpy as np
from jax.experimental import pallas as pl
from jax.experimental.pallas import tpu as pltpu


# ----------------------------------------------------------------------------
# Kernel: one grid step fuses the per-query epilogue for tq = 1024 queries,
# laid out as an (8, 128) lane-dense f32 block.
# ----------------------------------------------------------------------------
def _net_mlp_kernel(*refs, has_precedence, eval_path):
    """Refs (in order; bracketed ones only present for the given flags):

      c1v   [8,128]  c1[v_q]               (EmbedC result, gathered)
      [c2v] [8,128]  c2[v_q]               (EmbeddingPrecedence, if has_P)
      e1v   [8,128]  per-query scalar e[1]
      -- eval-only machine path (already reduced to per-node scalars) --------
      [sbv]  [8,128]  (B_m @ (W_m2 @ notj))[v_q]
      [dv]   [8,128]  d[v_q] = B_m[v_q,:]·W_m2[:,v_q]
      [njv]  [8,128]  notj[v_q]
      [pn]   SMEM (2,)  folded params  p = relu(wvv2)@wv3, n = relu(-wvv2)@wv3
      q_out [8,128]
    """
    it = iter(refs)
    c1_ref = next(it)
    c2_ref = next(it) if has_precedence else None
    e1_ref = next(it)
    if eval_path:
        sb_ref = next(it)
        d_ref = next(it)
        nj_ref = next(it)
        pn_ref = next(it)
    q_ref = next(it)

    c_last = c1_ref[...]
    if has_precedence:
        c_last = jnp.maximum(c_last, c2_ref[...])          # max(c1[v], c2[v])
    c_last = c_last + e1_ref[...]                          # + e[1]

    if eval_path:
        # s = B_m[v,:] · (W_m2 @ notj_masked_v)  (rank-1 machine path)
        s = sb_ref[...] - nj_ref[...] * d_ref[...]
        p = pn_ref[0]
        n = pn_ref[1]
        # relu(s * wvv2) @ wv3 == where(s>=0, s*p, -s*n)
        v3 = jnp.where(s >= 0.0, s * p, (-s) * n)
        q_ref[...] = c_last + v3
    else:
        q_ref[...] = c_last


# ----------------------------------------------------------------------------
# Cached precomputation (hoisted out of the per-query path, built with XLA)
# ----------------------------------------------------------------------------
def precompute_topology(graph, edge_e):
    """EmbedC / EmbeddingPrecedence results as per-node vectors (uses g.c)."""
    N = graph["c"].shape[0]
    c = graph["c"].astype(jnp.float32).reshape(N)
    # c1[i] = sum over edges j->i of c[j]
    c1 = jnp.zeros((N,), jnp.float32).at[edge_e[1]].add(c[edge_e[0]])
    eP = graph["edge_index_P"]
    has_P = int(eP.shape[1]) > 0                                # static branch
    c2 = (jnp.zeros((N,), jnp.float32).at[eP[1]].add(c[eP[0]])
          if has_P else None)
    return {"c1": c1, "c2": c2, "has_P": has_P, "N": N}


def precompute_machine(graph, m):
    """Machine-m tensors: dense once per machine; d[v] is notj-independent."""
    N = graph["c"].shape[0]
    m_edge = graph["index_m"][m - 1].T                          # [2, E_m]
    pt = graph["index_PT"][m - 1][:, 0].astype(jnp.float32)     # [E_m]
    # EmbeddingMachine2 over reversed edges with weight PT: em2 = W_m2 @ notj
    W_m2 = jnp.zeros((N, N), jnp.float32).at[m_edge[0], m_edge[1]].add(pt)
    # EmbeddingMachinemu2 over forward edges: emmu2 = B_m @ mu2
    B_m = jnp.zeros((N, N), jnp.float32).at[m_edge[1], m_edge[0]].add(1.0)
    # d[v] = B_m[v,:] · W_m2[:,v]  (per-node scalar used for the notj[v]=0 mask)
    d = jnp.sum(B_m * W_m2.T, axis=1)
    return {"W_m2": W_m2, "B_m": B_m, "d": d}


def fold_params(params):
    """Fold theta_v / theta_v2 / theta_v3 into two scalars (rank-1 structure)."""
    hp = jax.lax.Precision.HIGHEST
    wvv2 = jnp.dot(params["theta_v"].T, params["theta_v2"].T,
                   precision=hp).astype(jnp.float32)            # (1, F)
    wv3 = params["theta_v3"].T.astype(jnp.float32)              # (F, 1)
    p = jnp.dot(jnp.maximum(wvv2, 0.0), wv3, precision=hp)[0, 0]
    n = jnp.dot(jnp.maximum(-wvv2, 0.0), wv3, precision=hp)[0, 0]
    return p, n


# ----------------------------------------------------------------------------
# Batched forward: many (v, e[1]) queries on one graph / one machine per call
# ----------------------------------------------------------------------------
def net_mlp_forward_batched(params, graph, topo, mach, vs, e1s,
                            train=True, tq=1024, use_pallas=True):
    N = topo["N"]
    has_P = topo["has_P"]
    eval_path = not train

    vs = jnp.asarray(vs, jnp.int32).reshape(-1)
    e1s = jnp.asarray(e1s, jnp.float32).reshape(-1)
    Q = int(vs.shape[0])

    # Per-query gathers (O(Q) bytes) from the cached per-node vectors.
    c1v = topo["c1"][vs]
    c2v = topo["c2"][vs] if has_P else None
    if eval_path:
        notj_vec = graph["notj"].astype(jnp.float32).reshape(N)
        base = jnp.dot(mach["W_m2"], notj_vec)          # query-independent
        sb = jnp.dot(mach["B_m"], base)                 # (N,)
        sbv = sb[vs]
        dv = mach["d"][vs]
        njv = notj_vec[vs]
        p, n = fold_params(params)

    if not use_pallas:
        # Plain-XLA fast path for tiny Q (kernel launch overhead dominates).
        out = jnp.maximum(c1v, c2v) if has_P else c1v
        out = out + e1s
        if eval_path:
            s = sbv - njv * dv
            out = out + jnp.where(s >= 0.0, s * p, (-s) * n)
        return out

    # --- Pallas path: lane-dense [rows, 128] blocks, tq queries per grid step
    assert tq % 1024 == 0, "tq must be a multiple of 8*128 for (8,128) tiling"
    Qp = max(tq, ((Q + tq - 1) // tq) * tq)
    pad = Qp - Q
    rows = Qp // 128
    rows_per_blk = tq // 128                              # = 8 per 1024 queries

    def prep(x):
        return jnp.pad(x.astype(jnp.float32), (0, pad)).reshape(rows, 128)

    blk = pl.BlockSpec((rows_per_blk, 128), lambda q: (q, 0))

    args = [prep(c1v)]
    specs = [blk]
    if has_P:
        args.append(prep(c2v))
        specs.append(blk)
    args.append(prep(e1s))
    specs.append(blk)
    if eval_path:
        args += [prep(sbv), prep(dv), prep(njv), jnp.stack([p, n])]
        specs += [blk, blk, blk,
                  pl.BlockSpec(memory_space=pltpu.MemorySpace.SMEM)]

    kernel = functools.partial(_net_mlp_kernel,
                               has_precedence=has_P, eval_path=eval_path)
    out = pl.pallas_call(
        kernel,
        out_shape=jax.ShapeDtypeStruct((rows, 128), jnp.float32),
        grid=(Qp // tq,),
        in_specs=specs,
        out_specs=blk,
        compiler_params=pltpu.CompilerParams(
            dimension_semantics=("parallel",)),   # shards queries across TCs
    )(*args)
    return out.reshape(Qp)[:Q]


def net_mlp_forward(params, graph, v, e, m, train=True, topo=None, mach=None,
                    use_pallas=False):
    """Mirrors Net_MLP.forward(g, v, e, m, batch_size=1, Train=train).

    Single queries default to the XLA path (no pipeline/shard benefit at Q=1).
    """
    edge_e, e1 = e
    if topo is None:
        topo = precompute_topology(graph, edge_e)
    if mach is None and not train:
        mach = precompute_machine(graph, m)
    return net_mlp_forward_batched(params, graph, topo, mach,
                                   jnp.array([v]), jnp.array([e1]),
                                   train=train, use_pallas=use_pallas)


# ----------------------------------------------------------------------------
# Pure-JAX transcription of the PyTorch forward (correctness reference)
# ----------------------------------------------------------------------------
def net_mlp_reference(params, graph, v, e, m, train=True):
    edge_e, e1 = e
    N = graph["c"].shape[0]
    c = graph["c"].astype(jnp.float32)                           # [N, 1]
    hp = jax.lax.Precision.HIGHEST

    def scatter_add(edge, msg):
        return jnp.zeros((N, msg.shape[1]), jnp.float32).at[edge[1]].add(msg)

    c1 = scatter_add(edge_e, c[edge_e[0]])                       # EmbedC
    notj = graph["notj"].astype(jnp.float32).at[v, 0].set(0.0)   # g.notj[v] = 0
    eP = graph["edge_index_P"]
    has_P = int(eP.shape[1]) > 0
    c2 = scatter_add(eP, c[eP[0]]) if has_P else None            # EmbeddingPrecedence

    m_edge = graph["index_m"][m - 1].T
    pt = graph["index_PT"][m - 1].astype(jnp.float32)            # [E_m, 1]
    rev = jnp.stack([m_edge[1], m_edge[0]])
    em2 = scatter_add(rev, pt * notj[rev[0]])                    # EmbeddingMachine2
    mu2 = jnp.dot(em2, params["theta_v"].T, precision=hp)        # theta_v
    # g.notj[v] = 1; g.mu2 = g.mu2 * g.notj[v]  -> identity
    emmu2 = scatter_add(m_edge, mu2[m_edge[0]])                  # EmbeddingMachinemu2
    mu2 = jnp.maximum(jnp.dot(emmu2, params["theta_v2"].T, precision=hp), 0.0)

    c_last = jnp.maximum(c1[v], c2[v]) if has_P else c1[v]
    c_last = c_last + e1
    if train:
        return c_last
    v3 = jnp.dot(mu2, params["theta_v3"].T, precision=hp)[v]
    return v3 + c_last


def init_params(key, num_feats):
    k1, k2, k3 = jax.random.split(key, 3)
    return {
        # nn.Linear(in, out, bias=False).weight has shape (out, in)
        "theta_v": 0.1 * jax.random.normal(k1, (num_feats, 1), jnp.float32),
        "theta_v2": 0.1 * jax.random.normal(k2, (num_feats, num_feats), jnp.float32),
        "theta_v3": 0.1 * jax.random.normal(k3, (1, num_feats), jnp.float32),
    }


if __name__ == "__main__":
    key = jax.random.PRNGKey(0)
    N, F_ = 16, 32                     # nodes, num_feats
    E_e, E_P, E_m = 24, 12, 10

    ks = jax.random.split(key, 8)
    edge_index_e = jax.random.randint(ks[0], (2, E_e), 0, N)      # e[0]
    edge_index_P = jax.random.randint(ks[1], (2, E_P), 0, N)      # g.edge_index_P
    index_m = jax.random.randint(ks[2], (E_m, 2), 0, N)           # g.index_m[m-1]
    index_PT = jax.random.uniform(ks[3], (E_m, 1), jnp.float32)   # g.index_PT[m-1]
    c = jax.random.uniform(ks[4], (N, 1), jnp.float32)            # g.c
    notj = jnp.ones((N, 1), jnp.float32)                          # g.notj

    graph = {
        "c": c,
        "notj": notj,
        "edge_index_P": edge_index_P,
        "index_m": [index_m],
        "index_PT": [index_PT],
    }
    params = init_params(ks[5], F_)

    m = 1
    e1 = 2.5
    e = (edge_index_e, e1)

    # Cached once per (topology, machine); reused across every query.
    topo = precompute_topology(graph, edge_index_e)
    mach = precompute_machine(graph, m)

    # Batched queries through the Pallas kernel — both Train branches.
    vs = jnp.array([3, 7, 11], jnp.int32)
    e1s = jnp.array([2.5, 1.25, 0.5], jnp.float32)
    Q_train = net_mlp_forward_batched(params, graph, topo, mach, vs, e1s,
                                      train=True, use_pallas=True)
    Q_eval = net_mlp_forward_batched(params, graph, topo, mach, vs, e1s,
                                     train=False, use_pallas=True)
    jax.block_until_ready((Q_train, Q_eval))

    # Single-query API mirroring Net_MLP.forward(g, v, e, m) (XLA fast path).
    Q_single = net_mlp_forward(params, graph, int(vs[0]), e, m, train=False,
                               topo=topo, mach=mach)
    jax.block_until_ready(Q_single)

    # Correctness vs. a plain-JAX transcription of the PyTorch forward.
    ref_train = jnp.stack(
        [net_mlp_reference(params, graph, int(v), (edge_index_e, float(b)), m, True)[0]
         for v, b in zip(vs.tolist(), e1s.tolist())])
    ref_eval = jnp.stack(
        [net_mlp_reference(params, graph, int(v), (edge_index_e, float(b)), m, False)[0]
         for v, b in zip(vs.tolist(), e1s.tolist())])
    np.testing.assert_allclose(np.asarray(Q_train), np.asarray(ref_train),
                               rtol=5e-2, atol=5e-2)
    np.testing.assert_allclose(np.asarray(Q_eval), np.asarray(ref_eval),
                               rtol=5e-2, atol=5e-2)
    np.testing.assert_allclose(np.asarray(Q_single), np.asarray(ref_eval[:1]),
                               rtol=5e-2, atol=5e-2)

    # TODO(synk): batch_size > 1 branch is not implementable — it references
    # attributes (self.embedfinal, self.theta7, g.mu) never defined in the module.
    print("KERNEL_OK")
</pallas_src>

<mosaic_0001>
module attributes {stable_mosaic.version = 11 : i64} {
  func.func @_net_mlp_kernel(%arg0: i32, %arg1: memref<8x128xf32, #tpu.memory_space<vmem>>, %arg2: memref<8x128xf32, #tpu.memory_space<vmem>>, %arg3: memref<8x128xf32, #tpu.memory_space<vmem>>, %arg4: memref<8x128xf32, #tpu.memory_space<vmem>>) attributes {dimension_semantics = [#tpu.dimension_semantics<parallel>], iteration_bounds = array<i64: 1>, scalar_prefetch = 0 : i64, scratch_operands = 0 : i64, tpu.core_type = #tpu.core_type<tc>, window_params = [{transform_indices = @transform_0, window_bounds = array<i64: 8, 128>}, {transform_indices = @transform_1, window_bounds = array<i64: 8, 128>}, {transform_indices = @transform_2, window_bounds = array<i64: 8, 128>}, {transform_indices = @transform_3, window_bounds = array<i64: 8, 128>}]} {
    %c0 = arith.constant 0 : index
    %c0_0 = arith.constant 0 : index
    %0 = vector.load %arg1[%c0, %c0_0] : memref<8x128xf32, #tpu.memory_space<vmem>>, vector<8x128xf32>
    %c0_1 = arith.constant 0 : index
    %c0_2 = arith.constant 0 : index
    %1 = vector.load %arg2[%c0_1, %c0_2] : memref<8x128xf32, #tpu.memory_space<vmem>>, vector<8x128xf32>
    %2 = arith.maximumf %0, %1 : vector<8x128xf32>
    %c0_3 = arith.constant 0 : index
    %c0_4 = arith.constant 0 : index
    %3 = vector.load %arg3[%c0_3, %c0_4] : memref<8x128xf32, #tpu.memory_space<vmem>>, vector<8x128xf32>
    %4 = arith.addf %2, %3 : vector<8x128xf32>
    %c0_5 = arith.constant 0 : index
    %c0_6 = arith.constant 0 : index
    %5 = vector.load %arg4[%c0_5, %c0_6] : memref<8x128xf32, #tpu.memory_space<vmem>>, vector<8x128xf32>
    tpu.vector_store %arg4[%c0_5, %c0_6], %4 {strides = array<i32>} : memref<8x128xf32, #tpu.memory_space<vmem>>, vector<8x128xf32>,
    return
  }
  func.func @transform_0(%arg0: i32) -> (i32, i32) {
    %c0_i32 = arith.constant 0 : i32
    %c0_i32_0 = arith.constant 0 : i32
    return %arg0, %c0_i32 : i32, i32
  }
  func.func @transform_1(%arg0: i32) -> (i32, i32) {
    %c0_i32 = arith.constant 0 : i32
    %c0_i32_0 = arith.constant 0 : i32
    return %arg0, %c0_i32 : i32, i32
  }
  func.func @transform_2(%arg0: i32) -> (i32, i32) {
    %c0_i32 = arith.constant 0 : i32
    %c0_i32_0 = arith.constant 0 : i32
    return %arg0, %c0_i32 : i32, i32
  }
  func.func @transform_3(%arg0: i32) -> (i32, i32) {
    %c0_i32 = arith.constant 0 : i32
    %c0_i32_0 = arith.constant 0 : i32
    return %arg0, %c0_i32 : i32, i32
  }
}

</mosaic_0001>

<bundles_post_ra>
// kernel: tpu_custom_call.1
= control target key start
LH: loop header
LB: loop body
LE: loop exit
PB: predicated region body
PF: predicated region fallthrough
CT: control target
= control target key end

     0   :  { %8 = vsyncpa [#allocation3], 0  ;;  %s242_s0 = inlined_call_operand.hbm [shape: f32[8,128], index: 0, kind: input, shape index: {}]   ;;  %s243_s1 = inlined_call_operand.hbm [shape: f32[8,128], index: 1, kind: input, shape index: {}]   ;;  %s244_s2 = inlined_call_operand.hbm [shape: f32[8,128], index: 2, kind: input, shape index: {}]   ;;  %s245_s3 = inlined_call_operand.hbm [shape: f32[8,128], index: 3, kind: output, shape index: {}]  }
   0x1   :  { %9 = vsyncpa [#allocation6], 0 }
   0x2   :  { %10 = vsyncpa [#allocation4], 0  ;;  %s170_s12 = smov [#allocation5]   ;;  %s171_s14 = smov [#allocation2]  }
   0x3   :  { %s27_s13 = sshll.u32 %s170_s12, 4  ;;  %s17_s15 = sshll.u32 %s171_s14, 4  ;;  %s28_s13 = int_to_ptr.vmem [resolvable:$true] %s27_s13  ;;  %s18_s15 = int_to_ptr.vmem [resolvable:$true] %s17_s15 }
   0x4   :  { %s76_s18 = scalar_lea.hbm %s243_s1, 128 }
   0x5   :  { %p77_p0 = scmp.ne.s32.totalorder %s243_s1, %s76_s18  ;;  %p80_p1 = scmp.lt.u32.totalorder %s76_s18, %s243_s1 }
   0x7   :  { %p82_p2 = pnand %p80_p1, %p77_p0 }
   0x9   :  { %85 = shalt.err (!%p82_p2)
}
   0xa   :  { %s86_s23 = scalar_lea.vmem %s28_s13, 128  ;;  %p91_p4 = scmp.lt.s32.totalorder %s28_s13, %s28_s13 }
   0xb   :  { %p87_p3 = scmp.ne.s32.totalorder %s28_s13, %s86_s23  ;;  %p92_p5 = scmp.lt.s32.totalorder %s86_s23, %s86_s23 }
   0xd   :  { %p93_p6 = por %p92_p5, %p91_p4 }
   0xf   :  { %p94_p7 = pnand %p93_p6, %p87_p3 }
  0x11   :  { %97 = shalt.err (!%p94_p7)
}
  0x12   :  { %30 = dma.hbm_to_vmem [thread:$0]  %s243_s1, 128, %s28_s13, [#allocation6]  }
  0x13   :  { %s98_s28 = scalar_lea.hbm %s242_s0, 128 }
  0x14   :  { %p99_p8 = scmp.ne.s32.totalorder %s242_s0, %s98_s28  ;;  %p102_p9 = scmp.lt.u32.totalorder %s98_s28, %s242_s0 }
  0x16   :  { %p104_p10 = pnand %p102_p9, %p99_p8 }
  0x18   :  { %107 = shalt.err (!%p104_p10)
}
  0x19   :  { %s108_s6 = scalar_lea.vmem %s18_s15, 128  ;;  %p113_p12 = scmp.lt.s32.totalorder %s18_s15, %s18_s15 }
  0x1a   :  { %p109_p11 = scmp.ne.s32.totalorder %s18_s15, %s108_s6  ;;  %p114_p13 = scmp.lt.s32.totalorder %s108_s6, %s108_s6 }
  0x1c   :  { %p115_p0 = por %p114_p13, %p113_p12 }
  0x1e   :  { %p116_p1 = pnand %p115_p0, %p109_p11 }
  0x20   :  { %119 = shalt.err (!%p116_p1)
}
  0x21   :  { %20 = dma.hbm_to_vmem [thread:$0]  %s242_s0, 128, %s18_s15, [#allocation3]  }
  0x22   :  { %s172_s8 = smov [#allocation7]   ;;  %s120_s12 = scalar_lea.hbm %s244_s2, 128 }
  0x23   :  { %s37_s9 = sshll.u32 %s172_s8, 4  ;;  %p121_p2 = scmp.ne.s32.totalorder %s244_s2, %s120_s12  ;;  %s38_s9 = int_to_ptr.vmem [resolvable:$true] %s37_s9 }
  0x24   :  { %p124_p3 = scmp.lt.u32.totalorder %s120_s12, %s244_s2 }
  0x26   :  { %p126_p4 = pnand %p124_p3, %p121_p2 }
  0x28   :  { %129 = shalt.err (!%p126_p4)
}
  0x29   :  { %s130_s18 = scalar_lea.vmem %s38_s9, 128  ;;  %p135_p6 = scmp.lt.s32.totalorder %s38_s9, %s38_s9 }
  0x2a   :  { %p131_p5 = scmp.ne.s32.totalorder %s38_s9, %s130_s18  ;;  %p136_p7 = scmp.lt.s32.totalorder %s130_s18, %s130_s18 }
  0x2c   :  { %p137_p8 = por %p136_p7, %p135_p6 }
  0x2e   :  { %p138_p9 = pnand %p137_p8, %p131_p5 }
  0x30   :  { %141 = shalt.err (!%p138_p9)
}
  0x31   :  { %40 = dma.hbm_to_vmem [thread:$0]  %s244_s2, 128, %s38_s9, [#allocation6]  }
  0x32   :  { %164 = dma.done.wait [#allocation3], 128  }
  0x33   :  { %165 = vsyncadd [#allocation3], 4294967168 }
  0x34   :  { %166 = dma.done.wait [#allocation6], 256  }
  0x35   :  { %167 = vsyncadd [#allocation6], 4294967040  ;;  %v50_v0 = vld [vmem:[#allocation2] sm:$0xff]  ;;  %v51_v1 = vld [vmem:[#allocation5] sm:$0xff]  ;;  %s173_s19 = smov [#allocation8]  }
  0x36   :  { %v53_v2 = vld [vmem:[#allocation7] sm:$0xff]  ;;  %s62_s20 = sshll.u32 %s173_s19, 4  ;;  %v52_v3 = vmax.f32 %v50_v0, %v51_v1  ;;  %s63_s20 = int_to_ptr.vmem [resolvable:$true] %s62_s20 }
  0x37   :  { %s142_s21 = scalar_lea.vmem %s63_s20, 128  ;;  %p147_p11 = scmp.lt.s32.totalorder %s63_s20, %s63_s20 }
  0x38   :  { %v54_v4 = vadd.f32 %v53_v2, %v52_v3  ;;  %p143_p10 = scmp.ne.s32.totalorder %s63_s20, %s142_s21  ;;  %p148_p12 = scmp.lt.s32.totalorder %s142_s21, %s142_s21 }
  0x3a   :  { %55 = vst [vmem:[#allocation8] sm:$0xff] %v54_v4  ;;  %p149_p13 = por %p148_p12, %p147_p11 }
  0x3c   :  { %p150_p0 = pnand %p149_p13, %p143_p10 }
  0x3e   :  { %153 = shalt.err (!%p150_p0)
}
  0x3f   :  { %s154_s23 = scalar_lea.hbm %s245_s3, 128 }
  0x40   :  { %p155_p1 = scmp.ne.s32.totalorder %s245_s3, %s154_s23  ;;  %p158_p2 = scmp.lt.u32.totalorder %s154_s23, %s245_s3 }
  0x42   :  { %p160_p3 = pnand %p158_p2, %p155_p1 }
  0x44   :  { %163 = shalt.err (!%p160_p3)
}
  0x45   :  { %65 = dma.vmem_to_hbm [thread:$0]  %s63_s20, 128, %s245_s3, [#allocation4]  }
  0x46   :  { %168 = dma.done.wait [#allocation4], 128  }
  0x47   :  { %169 = vsyncadd [#allocation4], 4294967168 }
  0x48   :  { %69 = vsyncpa [#allocation3], 1 }
  0x49   :  { %70 = vsyncpa [#allocation6], 1 }
  0x4a   :  { %71 = vsyncpa [#allocation4], 1 }

</bundles_post_ra>
